<compile_context>
chip_gen: v5e
topology: v5e:2x2
jax: 0.10.0
libtpu: 0.0.40
codegen_flags: <defaults>
</compile_context>

<pallas_src>
import functools

import jax
import jax.numpy as jnp
from jax.experimental import pallas as pl
from jax.experimental.pallas import tpu as pltpu

_LANE = 128
_VMEM_LIMIT_BYTES = 32 * 1024 * 1024        # safe on v5e/v6e (128 MiB) and v7x (64 MiB)
_INPUT_VMEM_BUDGET = _VMEM_LIMIT_BYTES // 2  # inputs are double-buffered; keep headroom
_MAX_TILE_S = 32 * 1024                      # sanity cap on lanes per spatial tile
_MAX_ROW_BLOCK = 64                          # rows per block when R is large
_PAD_LOGIT = -1.0e30                         # masked elements contribute exactly 0


def _cdiv(a, b):
    return -(-a // b)


def _round_down(a, b):
    return (a // b) * b


def _plan(R, S, x_bytes, t_bytes, max_tile_s):
    """Static tiling plan (all Python ints)."""
    # Rows.
    if R <= _MAX_ROW_BLOCK:
        row_block, n_row_blocks = R, 1           # full-dim row block (no 8-divisibility needed)
    else:
        row_block, n_row_blocks = _MAX_ROW_BLOCK, _cdiv(R, _MAX_ROW_BLOCK)

    # Inner chunk: lanes processed per fori-loop step (register-carried partials).
    if S < _LANE:
        chunk = S
    else:
        units = max(1, min(4, 32 // max(row_block, 8)))   # rb=8 -> 512, 16 -> 256, >=32 -> 128
        chunk = min(units * _LANE, _round_down(S, _LANE))

    # Spatial tile from the VMEM byte budget (inputs are double-buffered).
    if S <= chunk:
        tile_s = chunk                                    # single full-width tile (== S)
    else:
        bytes_per_col = row_block * (x_bytes + t_bytes)
        cap = max(chunk, _INPUT_VMEM_BUDGET // (2 * bytes_per_col))
        cap = min(cap, max_tile_s)
        tile_s = max(chunk, min(_round_down(cap, chunk), _round_down(S, chunk)))
    m_total = _cdiv(S, tile_s)

    # Optional core split (keeps both v7x TensorCores busy when R is tiny):
    # slice 1 starts `slice_stride` tiles in; its first `overlap` tiles duplicate
    # slice 0 and are skipped in-kernel, so every DMA'd block starts in bounds.
    if n_row_blocks == 1 and m_total >= 2:
        n_slices = 2
        m = _cdiv(m_total, 2)
        slice_stride = m_total - m
        overlap = 2 * m - m_total
    else:
        n_slices, m, slice_stride, overlap = 1, m_total, 0, 0

    return dict(
        row_block=row_block, n_row_blocks=n_row_blocks,
        tile_s=tile_s, chunk=chunk, n_chunks=tile_s // chunk,
        acc_l=min(_LANE, chunk),
        n_slices=n_slices, m=m, slice_stride=slice_stride, overlap=overlap,
        need_row_mask=(n_row_blocks * row_block != R),
        need_col_mask=(m_total * tile_s != S),
    )


def _make_kernel(R, S, cfg):
    row_block = cfg["row_block"]
    tile_s = cfg["tile_s"]
    chunk = cfg["chunk"]
    n_chunks = cfg["n_chunks"]
    acc_l = cfg["acc_l"]
    slice_stride = cfg["slice_stride"]
    overlap = cfg["overlap"]
    need_row_mask = cfg["need_row_mask"]
    need_col_mask = cfg["need_col_mask"]
    unroll = True if n_chunks <= 8 else 4

    def kernel(x_ref, t_ref, inter_ref, denom_ref, bce_ref):
        c = pl.program_id(0)    # spatial slice (core split)
        r = pl.program_id(1)    # row block
        k = pl.program_id(2)    # spatial tile within slice (reduction axis)

        @pl.when(k == 0)
        def _():
            inter_ref[...] = jnp.zeros_like(inter_ref)
            denom_ref[...] = jnp.zeros_like(denom_ref)
            bce_ref[...] = jnp.zeros_like(bce_ref)

        def compute():
            if need_col_mask:
                col0 = (c * slice_stride + k) * tile_s
                col_iota = jax.lax.broadcasted_iota(jnp.int32, (1, chunk), 1)
            if need_row_mask:
                row_ok = (jax.lax.broadcasted_iota(jnp.int32, (row_block, 1), 0)
                          + r * row_block) < R

            zeros = jnp.zeros((row_block, chunk), jnp.float32)

            def body(ci, carry):
                inter, denom, bce = carry
                off = pl.multiple_of(ci * chunk, chunk)
                x = x_ref[:, pl.ds(off, chunk)].astype(jnp.float32)
                t = t_ref[:, pl.ds(off, chunk)].astype(jnp.float32)

                if need_col_mask or need_row_mask:
                    ok = None
                    if need_col_mask:
                        ok = (col_iota + (col0 + off)) < S
                    if need_row_mask:
                        ok = row_ok if ok is None else jnp.logical_and(ok, row_ok)
                    # Masked elements: sigmoid(-1e30)=0, bce(-1e30, 0)=0.
                    x = jnp.where(ok, x, _PAD_LOGIT)
                    t = jnp.where(ok, t, 0.0)

                # 2 EUP ops per element: tanh + log.
                th = jnp.tanh(0.5 * x)
                p = 0.5 * th + 0.5                 # sigmoid(x)
                q = 0.5 * jnp.abs(th) + 0.5        # sigmoid(|x|) = max(p, 1-p)
                bce_e = jnp.maximum(x, 0.0) - x * t - jnp.log(q)
                return inter + p * t, denom + (p + t), bce + bce_e

            inter, denom, bce = jax.lax.fori_loop(
                0, n_chunks, body, (zeros, zeros, zeros), unroll=unroll)

            def fold(a):  # (row_block, chunk) -> (row_block, acc_l) lane-group sum
                out = a[:, 0:acc_l]
                for j in range(1, chunk // acc_l):
                    out = out + a[:, j * acc_l:(j + 1) * acc_l]
                return out

            # One VMEM read-modify-write per accumulator per grid step.
            inter_ref[...] += fold(inter)[None, :, :]
            denom_ref[...] += fold(denom)[None, :, :]
            bce_ref[...] += fold(bce)[None, :, :]

        if overlap > 0:
            # Slice 1 re-visits `overlap` tiles already covered by slice 0; skip them.
            @pl.when(jnp.logical_or(c == 0, k >= overlap))
            def _():
                compute()
        else:
            compute()

    return kernel


def _combo_partial_sums(x2, t2, cfg):
    R, S = x2.shape
    row_block = cfg["row_block"]
    tile_s = cfg["tile_s"]
    acc_l = cfg["acc_l"]
    n_row_blocks = cfg["n_row_blocks"]
    n_slices = cfg["n_slices"]
    m = cfg["m"]
    slice_stride = cfg["slice_stride"]
    R_out = n_row_blocks * row_block

    in_map = lambda c, r, k: (r, c * slice_stride + k)
    acc_shape = jax.ShapeDtypeStruct((n_slices, R_out, acc_l), jnp.float32)
    acc_spec = pl.BlockSpec((1, row_block, acc_l), lambda c, r, k: (c, r, 0))

    cost = pl.CostEstimate(
        flops=16 * R * S,
        transcendentals=2 * R * S,
        bytes_accessed=R * S * (x2.dtype.itemsize + t2.dtype.itemsize)
        + 3 * n_slices * R_out * acc_l * 4,
    )

    return pl.pallas_call(
        _make_kernel(R, S, cfg),
        out_shape=(acc_shape, acc_shape, acc_shape),
        grid_spec=pltpu.PrefetchScalarGridSpec(
            num_scalar_prefetch=0,
            grid=(n_slices, n_row_blocks, m),
            in_specs=[
                pl.BlockSpec((row_block, tile_s), in_map),
                pl.BlockSpec((row_block, tile_s), in_map),
            ],
            out_specs=(acc_spec, acc_spec, acc_spec),
        ),
        compiler_params=pltpu.CompilerParams(
            dimension_semantics=("parallel", "parallel", "arbitrary"),
            vmem_limit_bytes=_VMEM_LIMIT_BYTES,
        ),
        cost_estimate=cost,
    )(x2, t2)


@functools.partial(jax.jit, static_argnames=("max_tile_s",))
def combo_loss(logits, targets, eps=1e-7, *, max_tile_s=_MAX_TILE_S):
    """ComboLoss = DiceLoss + BCEWithLogitsLoss on NCHW logits/targets."""
    B, C, H, W = logits.shape
    R, S = B * C, H * W

    # Native-dtype, no-copy reshapes (NCHW is contiguous over H*W).
    x2 = logits.reshape(R, S)
    t2 = targets.reshape(R, S)

    cfg = _plan(R, S,
                jnp.dtype(logits.dtype).itemsize,
                jnp.dtype(targets.dtype).itemsize,
                max_tile_s)

    inter128, denom128, bce128 = _combo_partial_sums(x2, t2, cfg)

    # Tiny final reductions stay in plain JAX; masked rows/cols are exact zeros.
    inter = jnp.sum(inter128, axis=(0, 2))[:R]
    denom = jnp.sum(denom128, axis=(0, 2))[:R]
    bce_total = jnp.sum(bce128)

    dice_loss = jnp.mean(1.0 - (2.0 * inter + eps) / (denom + eps))
    bce_loss = bce_total / (R * S)

    # ComboLoss.forward: sum of the individual loss values.
    return dice_loss + bce_loss


def _reference_combo_loss(logits, targets, eps=1e-7):
    """Pure-JAX reference mirroring the PyTorch semantics."""
    B, C, H, W = logits.shape
    x = logits.astype(jnp.float32).reshape(B * C, -1)
    t = targets.astype(jnp.float32).reshape(B * C, -1)
    p = jax.nn.sigmoid(x)
    inter = jnp.sum(p * t, axis=-1)
    dice = 1.0 - (2.0 * inter + eps) / (jnp.sum(p, -1) + jnp.sum(t, -1) + eps)
    dice_loss = jnp.mean(dice)
    bce = jnp.maximum(x, 0.0) - x * t + jnp.log1p(jnp.exp(-jnp.abs(x)))
    return dice_loss + jnp.mean(bce)


if __name__ == "__main__":
    root = jax.random.PRNGKey(0)

    cases = [
        # (shape, kwargs) -- extra cases exercise multi-tile / mask / core-split paths.
        ((2, 4, 16, 16), {}),                       # required small shape (single tile)
        ((1, 3, 18, 50), dict(max_tile_s=512)),     # core split, ragged columns, R=3
        ((5, 16, 24, 24), {}),                      # multiple row blocks + row/col masks
        ((2, 4, 32, 44), dict(max_tile_s=512)),     # core split, odd tile count (overlap skip)
    ]

    for i, (shape, kw) in enumerate(cases):
        k1, k2 = jax.random.split(jax.random.fold_in(root, i))
        logits = jax.random.normal(k1, shape, dtype=jnp.float32)
        targets = (jax.random.uniform(k2, shape) > 0.5).astype(jnp.float32)

        out = jax.block_until_ready(combo_loss(logits, targets, **kw))
        ref = _reference_combo_loss(logits, targets)
        assert jnp.allclose(out, ref, rtol=5e-5, atol=5e-5), (shape, out, ref)

    print("KERNEL_OK")
</pallas_src>

<mosaic_0001>
module attributes {stable_mosaic.version = 11 : i64} {
  func.func @kernel(%arg0: i32, %arg1: i32, %arg2: i32, %arg3: memref<8x256xf32, #tpu.memory_space<vmem>>, %arg4: memref<8x256xf32, #tpu.memory_space<vmem>>, %arg5: memref<1x8x128xf32, #tpu.memory_space<vmem>>, %arg6: memref<1x8x128xf32, #tpu.memory_space<vmem>>, %arg7: memref<1x8x128xf32, #tpu.memory_space<vmem>>) attributes {dimension_semantics = [#tpu.dimension_semantics<parallel>, #tpu.dimension_semantics<parallel>, #tpu.dimension_semantics<arbitrary>], iteration_bounds = array<i64: 1, 1, 1>, scalar_prefetch = 0 : i64, scratch_operands = 0 : i64, tpu.core_type = #tpu.core_type<tc>, window_params = [{transform_indices = @transform_0, window_bounds = array<i64: 8, 256>}, {transform_indices = @transform_1, window_bounds = array<i64: 8, 256>}, {transform_indices = @transform_2, window_bounds = array<i64: 1, 8, 128>}, {transform_indices = @transform_3, window_bounds = array<i64: 1, 8, 128>}, {transform_indices = @transform_4, window_bounds = array<i64: 1, 8, 128>}]} {
    %c0_i32 = arith.constant 0 : i32
    %0 = arith.cmpi eq, %arg2, %c0_i32 : i32
    %1 = arith.extui %0 : i1 to i32
    %c0_i32_0 = arith.constant 0 : i32
    %2 = arith.cmpi ne, %1, %c0_i32_0 : i32
    scf.if %2 {
      %cst_27 = arith.constant 0.000000e+00 : f32
      %54 = vector.broadcast %cst_27 : f32 to vector<1x8x128xf32>
      %c0_28 = arith.constant 0 : index
      %c0_29 = arith.constant 0 : index
      %c0_30 = arith.constant 0 : index
      %55 = vector.load %arg5[%c0_28, %c0_29, %c0_30] : memref<1x8x128xf32, #tpu.memory_space<vmem>>, vector<1x8x128xf32>
      tpu.vector_store %arg5[%c0_28, %c0_29, %c0_30], %54 {strides = array<i32>} : memref<1x8x128xf32, #tpu.memory_space<vmem>>, vector<1x8x128xf32>,
      %cst_31 = arith.constant 0.000000e+00 : f32
      %56 = vector.broadcast %cst_31 : f32 to vector<1x8x128xf32>
      %c0_32 = arith.constant 0 : index
      %c0_33 = arith.constant 0 : index
      %c0_34 = arith.constant 0 : index
      %57 = vector.load %arg6[%c0_32, %c0_33, %c0_34] : memref<1x8x128xf32, #tpu.memory_space<vmem>>, vector<1x8x128xf32>
      tpu.vector_store %arg6[%c0_32, %c0_33, %c0_34], %56 {strides = array<i32>} : memref<1x8x128xf32, #tpu.memory_space<vmem>>, vector<1x8x128xf32>,
      %cst_35 = arith.constant 0.000000e+00 : f32
      %58 = vector.broadcast %cst_35 : f32 to vector<1x8x128xf32>
      %c0_36 = arith.constant 0 : index
      %c0_37 = arith.constant 0 : index
      %c0_38 = arith.constant 0 : index
      %59 = vector.load %arg7[%c0_36, %c0_37, %c0_38] : memref<1x8x128xf32, #tpu.memory_space<vmem>>, vector<1x8x128xf32>
      tpu.vector_store %arg7[%c0_36, %c0_37, %c0_38], %58 {strides = array<i32>} : memref<1x8x128xf32, #tpu.memory_space<vmem>>, vector<1x8x128xf32>,
    } else {
    }
    %cst = arith.constant 0.000000e+00 : f32
    %3 = vector.broadcast %cst : f32 to vector<8x256xf32>
    %c0_i32_1 = arith.constant 0 : i32
    %c256_i32 = arith.constant 256 : i32
    %4 = arith.muli %c0_i32_1, %c256_i32 : i32
    %5 = tpu.assume_multiple %4, 256 : i32
    %c0 = arith.constant 0 : index
    %6 = arith.index_cast %5 : i32 to index
    %7 = vector.load %arg3[%c0, %6] : memref<8x256xf32, #tpu.memory_space<vmem>>, vector<8x256xf32>
    %c0_2 = arith.constant 0 : index
    %8 = arith.index_cast %5 : i32 to index
    %9 = vector.load %arg4[%c0_2, %8] : memref<8x256xf32, #tpu.memory_space<vmem>>, vector<8x256xf32>
    %cst_3 = arith.constant 5.000000e-01 : f32
    %10 = vector.broadcast %cst_3 : f32 to vector<8x256xf32>
    %11 = arith.mulf %10, %7 : vector<8x256xf32>
    %12 = math.tanh %11 : vector<8x256xf32>
    %cst_4 = arith.constant 5.000000e-01 : f32
    %13 = vector.broadcast %cst_4 : f32 to vector<8x256xf32>
    %14 = arith.mulf %13, %12 : vector<8x256xf32>
    %cst_5 = arith.constant 5.000000e-01 : f32
    %15 = vector.broadcast %cst_5 : f32 to vector<8x256xf32>
    %16 = arith.addf %14, %15 : vector<8x256xf32>
    %17 = math.absf %12 : vector<8x256xf32>
    %cst_6 = arith.constant 5.000000e-01 : f32
    %18 = vector.broadcast %cst_6 : f32 to vector<8x256xf32>
    %19 = arith.mulf %18, %17 : vector<8x256xf32>
    %cst_7 = arith.constant 5.000000e-01 : f32
    %20 = vector.broadcast %cst_7 : f32 to vector<8x256xf32>
    %21 = arith.addf %19, %20 : vector<8x256xf32>
    %cst_8 = arith.constant 0.000000e+00 : f32
    %22 = vector.broadcast %cst_8 : f32 to vector<8x256xf32>
    %23 = arith.maximumf %7, %22 : vector<8x256xf32>
    %24 = arith.mulf %7, %9 : vector<8x256xf32>
    %25 = arith.subf %23, %24 : vector<8x256xf32>
    %26 = math.log %21 : vector<8x256xf32>
    %27 = arith.subf %25, %26 : vector<8x256xf32>
    %28 = arith.mulf %16, %9 : vector<8x256xf32>
    %29 = arith.addf %3, %28 : vector<8x256xf32>
    %30 = arith.addf %16, %9 : vector<8x256xf32>
    %31 = arith.addf %3, %30 : vector<8x256xf32>
    %32 = arith.addf %3, %27 : vector<8x256xf32>
    %c1_i32 = arith.constant 1 : i32
    %c0_9 = arith.constant 0 : index
    %c0_10 = arith.constant 0 : index
    %c0_11 = arith.constant 0 : index
    %33 = vector.load %arg5[%c0_9, %c0_10, %c0_11] : memref<1x8x128xf32, #tpu.memory_space<vmem>>, vector<1x8x128xf32>
    %34 = vector.extract_strided_slice %29 {offsets = [0, 0], sizes = [8, 128], strides = [1, 1]} : vector<8x256xf32> to vector<8x128xf32>
    %35 = vector.extract_strided_slice %29 {offsets = [0, 128], sizes = [8, 128], strides = [1, 1]} : vector<8x256xf32> to vector<8x128xf32>
    %36 = arith.addf %34, %35 : vector<8x128xf32>
    %37 = vector.shape_cast %36 : vector<8x128xf32> to vector<1x8x128xf32>
    %38 = arith.addf %33, %37 : vector<1x8x128xf32>
    %c0_12 = arith.constant 0 : index
    %c0_13 = arith.constant 0 : index
    %c0_14 = arith.constant 0 : index
    %39 = vector.load %arg5[%c0_12, %c0_13, %c0_14] : memref<1x8x128xf32, #tpu.memory_space<vmem>>, vector<1x8x128xf32>
    tpu.vector_store %arg5[%c0_12, %c0_13, %c0_14], %38 {strides = array<i32>} : memref<1x8x128xf32, #tpu.memory_space<vmem>>, vector<1x8x128xf32>,
    %c0_15 = arith.constant 0 : index
    %c0_16 = arith.constant 0 : index
    %c0_17 = arith.constant 0 : index
    %40 = vector.load %arg6[%c0_15, %c0_16, %c0_17] : memref<1x8x128xf32, #tpu.memory_space<vmem>>, vector<1x8x128xf32>
    %41 = vector.extract_strided_slice %31 {offsets = [0, 0], sizes = [8, 128], strides = [1, 1]} : vector<8x256xf32> to vector<8x128xf32>
    %42 = vector.extract_strided_slice %31 {offsets = [0, 128], sizes = [8, 128], strides = [1, 1]} : vector<8x256xf32> to vector<8x128xf32>
    %43 = arith.addf %41, %42 : vector<8x128xf32>
    %44 = vector.shape_cast %43 : vector<8x128xf32> to vector<1x8x128xf32>
    %45 = arith.addf %40, %44 : vector<1x8x128xf32>
    %c0_18 = arith.constant 0 : index
    %c0_19 = arith.constant 0 : index
    %c0_20 = arith.constant 0 : index
    %46 = vector.load %arg6[%c0_18, %c0_19, %c0_20] : memref<1x8x128xf32, #tpu.memory_space<vmem>>, vector<1x8x128xf32>
    tpu.vector_store %arg6[%c0_18, %c0_19, %c0_20], %45 {strides = array<i32>} : memref<1x8x128xf32, #tpu.memory_space<vmem>>, vector<1x8x128xf32>,
    %c0_21 = arith.constant 0 : index
    %c0_22 = arith.constant 0 : index
    %c0_23 = arith.constant 0 : index
    %47 = vector.load %arg7[%c0_21, %c0_22, %c0_23] : memref<1x8x128xf32, #tpu.memory_space<vmem>>, vector<1x8x128xf32>
    %48 = vector.extract_strided_slice %32 {offsets = [0, 0], sizes = [8, 128], strides = [1, 1]} : vector<8x256xf32> to vector<8x128xf32>
    %49 = vector.extract_strided_slice %32 {offsets = [0, 128], sizes = [8, 128], strides = [1, 1]} : vector<8x256xf32> to vector<8x128xf32>
    %50 = arith.addf %48, %49 : vector<8x128xf32>
    %51 = vector.shape_cast %50 : vector<8x128xf32> to vector<1x8x128xf32>
    %52 = arith.addf %47, %51 : vector<1x8x128xf32>
    %c0_24 = arith.constant 0 : index
    %c0_25 = arith.constant 0 : index
    %c0_26 = arith.constant 0 : index
    %53 = vector.load %arg7[%c0_24, %c0_25, %c0_26] : memref<1x8x128xf32, #tpu.memory_space<vmem>>, vector<1x8x128xf32>
    tpu.vector_store %arg7[%c0_24, %c0_25, %c0_26], %52 {strides = array<i32>} : memref<1x8x128xf32, #tpu.memory_space<vmem>>, vector<1x8x128xf32>,
    return
  }
  func.func @transform_0(%arg0: i32, %arg1: i32, %arg2: i32) -> (i32, i32) {
    %c0_i32 = arith.constant 0 : i32
    %0 = arith.muli %arg0, %c0_i32 : i32
    %1 = arith.addi %0, %arg2 : i32
    %c0_i32_0 = arith.constant 0 : i32
    return %arg1, %1 : i32, i32
  }
  func.func @transform_1(%arg0: i32, %arg1: i32, %arg2: i32) -> (i32, i32) {
    %c0_i32 = arith.constant 0 : i32
    %0 = arith.muli %arg0, %c0_i32 : i32
    %1 = arith.addi %0, %arg2 : i32
    %c0_i32_0 = arith.constant 0 : i32
    return %arg1, %1 : i32, i32
  }
  func.func @transform_2(%arg0: i32, %arg1: i32, %arg2: i32) -> (i32, i32, i32) {
    %c0_i32 = arith.constant 0 : i32
    %c0_i32_0 = arith.constant 0 : i32
    return %arg0, %arg1, %c0_i32 : i32, i32, i32
  }
  func.func @transform_3(%arg0: i32, %arg1: i32, %arg2: i32) -> (i32, i32, i32) {
    %c0_i32 = arith.constant 0 : i32
    %c0_i32_0 = arith.constant 0 : i32
    return %arg0, %arg1, %c0_i32 : i32, i32, i32
  }
  func.func @transform_4(%arg0: i32, %arg1: i32, %arg2: i32) -> (i32, i32, i32) {
    %c0_i32 = arith.constant 0 : i32
    %c0_i32_0 = arith.constant 0 : i32
    return %arg0, %arg1, %c0_i32 : i32, i32, i32
  }
}

</mosaic_0001>

<bundles_post_ra>
// kernel: combo_loss.1
= control target key start
LH: loop header
LB: loop body
LE: loop exit
PB: predicated region body
PF: predicated region fallthrough
CT: control target
= control target key end

     0   :  { %s140_s0 = inlined_call_operand.vmem [shape: f32[8,256], index: 0, kind: input, shape index: {}]   ;;  %s141_s1 = inlined_call_operand.vmem [shape: f32[8,256], index: 1, kind: input, shape index: {}]   ;;  %s142_s2 = inlined_call_operand.vmem [shape: f32[1,8,128], index: 2, kind: output, shape index: {0}]   ;;  %s143_s3 = inlined_call_operand.vmem [shape: f32[1,8,128], index: 3, kind: output, shape index: {1}]   ;;  %s144_s4 = inlined_call_operand.vmem [shape: f32[1,8,128], index: 4, kind: output, shape index: {2}]  }
   0x1   :  { %v21_v0 = vld [vmem:[%s140_s0] sm:$0xff]  ;;  %v22_v1 = vld [vmem:[%s140_s0 + $0x8] sm:$0xff] }
   0x2   :  { %v25_v2 = vmul.f32 0.5, %v21_v0  ;;  %v26_v3 = vmul.f32 0.5, %v22_v1  ;;  %v23_v12 = vld [vmem:[%s141_s1] sm:$0xff]  ;;  %v24_v15 = vld [vmem:[%s141_s1 + $0x8] sm:$0xff]  ;;  %v39_v22 = vmax.f32 %v21_v0, 0.0  ;;  %v40_v26 = vmax.f32 %v22_v1, 0.0 }
   0x3   :  { %v41_v25 = vmul.f32 %v23_v12, %v21_v0  ;;  %v42_v27 = vmul.f32 %v24_v15, %v22_v1 }
   0x4   :  { %86 = vtanh.f32 %v25_v2 }
   0x5   :  { %88 = vtanh.f32 %v26_v3  ;;  %v43_v28 = vsub.f32 %v39_v22, %v41_v25  ;;  %v44_v30 = vsub.f32 %v40_v26, %v42_v27 }
   0xa   :  { %v87_v4 = vpop.eup %86 }
   0xb   :  { %v89_v5 = vpop.eup %88  ;;  %v29_v6 = vmul.f32 0.5, %v87_v4  ;;  %v33_v7 = vand.u32 2147483647, %v87_v4 }
   0xc   :  { %v30_v8 = vmul.f32 0.5, %v89_v5  ;;  %v34_v9 = vand.u32 2147483647, %v89_v5 }
   0xd   :  { %v31_v10 = vadd.f32 0.5, %v29_v6  ;;  %v35_v11 = vmul.f32 0.5, %v33_v7 }
   0xe   :  { %v32_v13 = vadd.f32 0.5, %v30_v8  ;;  %v36_v14 = vmul.f32 0.5, %v34_v9 }
   0xf   :  { %v51_v16 = vmul.f32 %v31_v10, %v23_v12  ;;  %v55_v17 = vadd.f32 %v31_v10, %v23_v12  ;;  %v37_v18 = vadd.f32 0.5, %v35_v11 }
  0x10   :  { %v52_v19 = vmul.f32 %v32_v13, %v24_v15  ;;  %v56_v20 = vadd.f32 %v32_v13, %v24_v15  ;;  %v38_v21 = vadd.f32 0.5, %v36_v14 }
  0x11   :  { %90 = vlog2.f32 %v37_v18 }
  0x12   :  { %v62_v23 = vadd.f32 %v52_v19, %v51_v16  ;;  %v66_v24 = vadd.f32 %v56_v20, %v55_v17  ;;  %92 = vlog2.f32 %v38_v21 }
  0x14   :  { %64 = vst [vmem:[%s142_s2] sm:$0xff] %v62_v23 }
  0x15   :  { %68 = vst [vmem:[%s143_s3] sm:$0xff] %v66_v24 }
  0x17   :  { %v91_v29 = vpop.eup %90 }
  0x18   :  { %v93_v31 = vpop.eup %92  ;;  %v46_v32 = vmul.f32 0.6931472, %v91_v29 }
  0x19   :  { %v48_v33 = vmul.f32 0.6931472, %v93_v31 }
  0x1a   :  { %v49_v34 = vsub.f32 %v43_v28, %v46_v32 }
  0x1b   :  { %v50_v35 = vsub.f32 %v44_v30, %v48_v33 }
  0x1d   :  { %v70_v36 = vadd.f32 %v50_v35, %v49_v34 }
  0x1f   :  { %72 = vst [vmem:[%s144_s4] sm:$0xff] %v70_v36 }

</bundles_post_ra>
